<compile_context>
chip_gen: v5e
topology: v5e:2x2
jax: 0.10.0
libtpu: 0.0.40
codegen_flags: <defaults>
</compile_context>

<pallas_src>
import jax
import jax.numpy as jnp
from jax import lax
from jax.experimental import pallas as pl
from jax.experimental.pallas import tpu as pltpu


def _patch_embed_kernel(x_ref, sel_ref, rmat_ref, bias_ref, o_ref):
    # x_ref   : (1, C*H, W)          one NCHW image, flat-viewed (free reshape)
    # sel_ref : (P, OW, W)           sel[kx, ow, w] = [w == ow*S + kx]
    # rmat_ref: (P, C*H, E*OH)       rmat[kx, c*H+h, e*OH+oh] = Wf[e,c,h-oh*S,kx]
    # bias_ref: (1, E*OH)            folded BN bias, repeated over oh
    # o_ref   : (1, OW, E*OH)        out[ow, e*OH+oh] = conv+BN result
    P = sel_ref.shape[0]
    _, OW, EOH = o_ref.shape

    x2 = x_ref[0]                                   # (C*H, W)
    acc = jnp.zeros((OW, EOH), jnp.float32)
    for kx in range(P):                             # P is small & static -> unrolled
        # Lane-side tap selection done on the MXU (contract W of both operands):
        #   cols[ow, c*H+h] = x[c, h, ow*S + kx]
        cols = lax.dot_general(
            sel_ref[kx], x2, (((1,), (1,)), ((), ())),
            preferred_element_type=jnp.float32)     # (OW, C*H)
        # Contract (c, ky) against the BN-folded weights for this kx tap.
        acc = acc + jnp.dot(cols, rmat_ref[kx],
                            preferred_element_type=jnp.float32)  # (OW, E*OH)
    o_ref[0] = acc + bias_ref[...]                  # broadcast bias over ow rows


def patch_embed_fasternet_pallas(x, weight, gamma, beta, mean, var,
                                 *, patch_size, patch_stride, eps=1e-5):
    """x: (N, C, H, W) f32 NCHW. weight: (E, C, P, P) (PyTorch OIHW). Returns NCHW."""
    N, C, H, W = x.shape
    E = weight.shape[0]
    P, S = patch_size, patch_stride
    OH = (H - P) // S + 1
    OW = (W - P) // S + 1
    EOH = E * OH

    # ---- fold eval-mode BatchNorm into the conv weight + a per-channel bias ----
    scale = gamma / jnp.sqrt(var + eps)                       # (E,)
    bias = beta - mean * scale                                # (E,)
    wf = weight.astype(jnp.float32) * scale[:, None, None, None]  # (E, C, P, P)

    # ---- constant selection / weight slabs (built once at trace time) ----
    # sel[kx, ow, w] = 1 iff w == ow*S + kx
    sel = (jnp.arange(W)[None, None, :] ==
           (jnp.arange(OW)[None, :, None] * S + jnp.arange(P)[:, None, None])
           ).astype(jnp.float32)                              # (P, OW, W)
    # onehot_h[oh, ky, h] = 1 iff h == oh*S + ky
    onehot_h = (jnp.arange(H)[None, None, :] ==
                (jnp.arange(OH)[:, None, None] * S + jnp.arange(P)[None, :, None])
                ).astype(jnp.float32)                         # (OH, P, H)
    # rmat[kx, c*H + h, e*OH + oh] = wf[e, c, h - oh*S, kx] (0 outside the tap)
    rmat = jnp.einsum('eckx,okh->xcheo', wf, onehot_h).reshape(P, C * H, EOH)
    bias_row = jnp.repeat(bias, OH)[None, :]                  # (1, E*OH)

    x_flat = x.reshape(N, C * H, W)                           # free row-major view

    out = pl.pallas_call(
        _patch_embed_kernel,
        out_shape=jax.ShapeDtypeStruct((N, OW, EOH), jnp.float32),
        grid=(N,),
        in_specs=[
            pl.BlockSpec((1, C * H, W), lambda n: (n, 0, 0)),
            pl.BlockSpec((P, OW, W), lambda n: (0, 0, 0)),
            pl.BlockSpec((P, C * H, EOH), lambda n: (0, 0, 0)),
            pl.BlockSpec((1, EOH), lambda n: (0, 0)),
        ],
        out_specs=pl.BlockSpec((1, OW, EOH), lambda n: (n, 0, 0)),
        compiler_params=pltpu.CompilerParams(
            dimension_semantics=("parallel",)),
    )(x_flat, sel, rmat, bias_row)

    # (N, OW, E*OH) -> (N, E, OH, OW): tiny output, pure layout plumbing.
    return out.reshape(N, OW, E, OH).transpose(0, 2, 3, 1)


def _reference(x, weight, gamma, beta, mean, var, *, patch_size, patch_stride, eps):
    y = lax.conv_general_dilated(
        x, weight, window_strides=(patch_stride, patch_stride), padding='VALID',
        dimension_numbers=('NCHW', 'OIHW', 'NCHW'),
        precision=lax.Precision.HIGHEST)
    scale = gamma / jnp.sqrt(var + eps)
    bias = beta - mean * scale
    return y * scale[None, :, None, None] + bias[None, :, None, None]


if __name__ == "__main__":
    # small shapes consistent with the module: in_chans=4, embed_dim=32,
    # patch_size = patch_stride = 4, input (2, 4, 16, 16) -> output (2, 32, 4, 4)
    N, C, H, W = 2, 4, 16, 16
    E = 32
    P = S = 4
    eps = 1e-5

    key = jax.random.PRNGKey(0)
    k = jax.random.split(key, 6)
    x = jax.random.normal(k[0], (N, C, H, W), jnp.float32)
    weight = 0.2 * jax.random.normal(k[1], (E, C, P, P), jnp.float32)   # proj.weight
    gamma = 1.0 + 0.1 * jax.random.normal(k[2], (E,), jnp.float32)      # BN params
    beta = 0.1 * jax.random.normal(k[3], (E,), jnp.float32)
    mean = 0.1 * jax.random.normal(k[4], (E,), jnp.float32)
    var = jnp.abs(jax.random.normal(k[5], (E,), jnp.float32)) + 0.5

    out = patch_embed_fasternet_pallas(x, weight, gamma, beta, mean, var,
                                       patch_size=P, patch_stride=S, eps=eps)
    out = jax.block_until_ready(out)

    ref = _reference(x, weight, gamma, beta, mean, var,
                     patch_size=P, patch_stride=S, eps=eps)

    OH, OW = (H - P) // S + 1, (W - P) // S + 1
    assert out.shape == (N, E, OH, OW), out.shape
    max_diff = float(jnp.max(jnp.abs(out - ref)))
    assert jnp.allclose(out, ref, rtol=1e-4, atol=1e-4), max_diff

    print("KERNEL_OK")
</pallas_src>

<mosaic_0001>
module attributes {stable_mosaic.version = 11 : i64} {
  func.func @_patch_embed_kernel(%arg0: i32, %arg1: memref<1x64x16xf32, #tpu.memory_space<vmem>>, %arg2: memref<4x4x16xf32, #tpu.memory_space<vmem>>, %arg3: memref<4x64x128xf32, #tpu.memory_space<vmem>>, %arg4: memref<1x128xf32, #tpu.memory_space<vmem>>, %arg5: memref<1x4x128xf32, #tpu.memory_space<vmem>>) attributes {dimension_semantics = [#tpu.dimension_semantics<parallel>], iteration_bounds = array<i64: 2>, scalar_prefetch = 0 : i64, scratch_operands = 0 : i64, tpu.core_type = #tpu.core_type<tc>, window_params = [{transform_indices = @transform_0, window_bounds = array<i64: 1, 64, 16>}, {pipeline_mode = #tpu.pipeline_mode<synchronous>, transform_indices = @transform_1, window_bounds = array<i64: 4, 4, 16>}, {pipeline_mode = #tpu.pipeline_mode<synchronous>, transform_indices = @transform_2, window_bounds = array<i64: 4, 64, 128>}, {pipeline_mode = #tpu.pipeline_mode<synchronous>, transform_indices = @transform_3, window_bounds = array<i64: 1, 128>}, {transform_indices = @transform_4, window_bounds = array<i64: 1, 4, 128>}]} {
    %c0 = arith.constant 0 : index
    %c0_0 = arith.constant 0 : index
    %c0_1 = arith.constant 0 : index
    %0 = vector.load %arg1[%c0, %c0_0, %c0_1] : memref<1x64x16xf32, #tpu.memory_space<vmem>>, vector<1x64x16xf32>
    %1 = vector.shape_cast %0 : vector<1x64x16xf32> to vector<64x16xf32>
    %cst = arith.constant 0.000000e+00 : f32
    %2 = vector.broadcast %cst : f32 to vector<4x128xf32>
    %c0_2 = arith.constant 0 : index
    %c0_3 = arith.constant 0 : index
    %c0_4 = arith.constant 0 : index
    %3 = vector.load %arg2[%c0_2, %c0_3, %c0_4] : memref<4x4x16xf32, #tpu.memory_space<vmem>>, vector<1x4x16xf32>
    %4 = vector.shape_cast %3 : vector<1x4x16xf32> to vector<4x16xf32>
    %cst_5 = arith.constant dense<0.000000e+00> : vector<4x64xf32>
    %5 = tpu.matmul %4, %1, %cst_5 {dimension_numbers = #tpu.dot_dimension_numbers<[1], [1], [0], [0], [0, 0, 1, 0], [], []>} : vector<4x16xf32>, vector<64x16xf32>, vector<4x64xf32> -> vector<4x64xf32>
    %c0_6 = arith.constant 0 : index
    %c0_7 = arith.constant 0 : index
    %c0_8 = arith.constant 0 : index
    %6 = vector.load %arg3[%c0_6, %c0_7, %c0_8] : memref<4x64x128xf32, #tpu.memory_space<vmem>>, vector<1x64x128xf32>
    %7 = vector.shape_cast %6 : vector<1x64x128xf32> to vector<64x128xf32>
    %cst_9 = arith.constant dense<0.000000e+00> : vector<4x128xf32>
    %8 = tpu.matmul %5, %7, %cst_9 {dimension_numbers = #tpu.dot_dimension_numbers<[1], [0], [0], [1], [0, 0, 1, 1], [], []>} : vector<4x64xf32>, vector<64x128xf32>, vector<4x128xf32> -> vector<4x128xf32>
    %9 = arith.addf %2, %8 : vector<4x128xf32>
    %c1 = arith.constant 1 : index
    %c0_10 = arith.constant 0 : index
    %c0_11 = arith.constant 0 : index
    %10 = vector.load %arg2[%c1, %c0_10, %c0_11] : memref<4x4x16xf32, #tpu.memory_space<vmem>>, vector<1x4x16xf32>
    %11 = vector.shape_cast %10 : vector<1x4x16xf32> to vector<4x16xf32>
    %cst_12 = arith.constant dense<0.000000e+00> : vector<4x64xf32>
    %12 = tpu.matmul %11, %1, %cst_12 {dimension_numbers = #tpu.dot_dimension_numbers<[1], [1], [0], [0], [0, 0, 1, 0], [], []>} : vector<4x16xf32>, vector<64x16xf32>, vector<4x64xf32> -> vector<4x64xf32>
    %c1_13 = arith.constant 1 : index
    %c0_14 = arith.constant 0 : index
    %c0_15 = arith.constant 0 : index
    %13 = vector.load %arg3[%c1_13, %c0_14, %c0_15] : memref<4x64x128xf32, #tpu.memory_space<vmem>>, vector<1x64x128xf32>
    %14 = vector.shape_cast %13 : vector<1x64x128xf32> to vector<64x128xf32>
    %cst_16 = arith.constant dense<0.000000e+00> : vector<4x128xf32>
    %15 = tpu.matmul %12, %14, %cst_16 {dimension_numbers = #tpu.dot_dimension_numbers<[1], [0], [0], [1], [0, 0, 1, 1], [], []>} : vector<4x64xf32>, vector<64x128xf32>, vector<4x128xf32> -> vector<4x128xf32>
    %16 = arith.addf %9, %15 : vector<4x128xf32>
    %c2 = arith.constant 2 : index
    %c0_17 = arith.constant 0 : index
    %c0_18 = arith.constant 0 : index
    %17 = vector.load %arg2[%c2, %c0_17, %c0_18] : memref<4x4x16xf32, #tpu.memory_space<vmem>>, vector<1x4x16xf32>
    %18 = vector.shape_cast %17 : vector<1x4x16xf32> to vector<4x16xf32>
    %cst_19 = arith.constant dense<0.000000e+00> : vector<4x64xf32>
    %19 = tpu.matmul %18, %1, %cst_19 {dimension_numbers = #tpu.dot_dimension_numbers<[1], [1], [0], [0], [0, 0, 1, 0], [], []>} : vector<4x16xf32>, vector<64x16xf32>, vector<4x64xf32> -> vector<4x64xf32>
    %c2_20 = arith.constant 2 : index
    %c0_21 = arith.constant 0 : index
    %c0_22 = arith.constant 0 : index
    %20 = vector.load %arg3[%c2_20, %c0_21, %c0_22] : memref<4x64x128xf32, #tpu.memory_space<vmem>>, vector<1x64x128xf32>
    %21 = vector.shape_cast %20 : vector<1x64x128xf32> to vector<64x128xf32>
    %cst_23 = arith.constant dense<0.000000e+00> : vector<4x128xf32>
    %22 = tpu.matmul %19, %21, %cst_23 {dimension_numbers = #tpu.dot_dimension_numbers<[1], [0], [0], [1], [0, 0, 1, 1], [], []>} : vector<4x64xf32>, vector<64x128xf32>, vector<4x128xf32> -> vector<4x128xf32>
    %23 = arith.addf %16, %22 : vector<4x128xf32>
    %c3 = arith.constant 3 : index
    %c0_24 = arith.constant 0 : index
    %c0_25 = arith.constant 0 : index
    %24 = vector.load %arg2[%c3, %c0_24, %c0_25] : memref<4x4x16xf32, #tpu.memory_space<vmem>>, vector<1x4x16xf32>
    %25 = vector.shape_cast %24 : vector<1x4x16xf32> to vector<4x16xf32>
    %cst_26 = arith.constant dense<0.000000e+00> : vector<4x64xf32>
    %26 = tpu.matmul %25, %1, %cst_26 {dimension_numbers = #tpu.dot_dimension_numbers<[1], [1], [0], [0], [0, 0, 1, 0], [], []>} : vector<4x16xf32>, vector<64x16xf32>, vector<4x64xf32> -> vector<4x64xf32>
    %c3_27 = arith.constant 3 : index
    %c0_28 = arith.constant 0 : index
    %c0_29 = arith.constant 0 : index
    %27 = vector.load %arg3[%c3_27, %c0_28, %c0_29] : memref<4x64x128xf32, #tpu.memory_space<vmem>>, vector<1x64x128xf32>
    %28 = vector.shape_cast %27 : vector<1x64x128xf32> to vector<64x128xf32>
    %cst_30 = arith.constant dense<0.000000e+00> : vector<4x128xf32>
    %29 = tpu.matmul %26, %28, %cst_30 {dimension_numbers = #tpu.dot_dimension_numbers<[1], [0], [0], [1], [0, 0, 1, 1], [], []>} : vector<4x64xf32>, vector<64x128xf32>, vector<4x128xf32> -> vector<4x128xf32>
    %30 = arith.addf %23, %29 : vector<4x128xf32>
    %c0_31 = arith.constant 0 : index
    %c0_32 = arith.constant 0 : index
    %31 = vector.load %arg4[%c0_31, %c0_32] : memref<1x128xf32, #tpu.memory_space<vmem>>, vector<1x128xf32>
    %32 = vector.broadcast %31 : vector<1x128xf32> to vector<4x128xf32>
    %33 = arith.addf %30, %32 : vector<4x128xf32>
    %c0_33 = arith.constant 0 : index
    %c0_34 = arith.constant 0 : index
    %c0_35 = arith.constant 0 : index
    %34 = vector.load %arg5[%c0_33, %c0_34, %c0_35] : memref<1x4x128xf32, #tpu.memory_space<vmem>>, vector<1x4x128xf32>
    %35 = vector.shape_cast %34 : vector<1x4x128xf32> to vector<4x128xf32>
    %36 = vector.shape_cast %33 : vector<4x128xf32> to vector<1x4x128xf32>
    tpu.vector_store %arg5[%c0_33, %c0_34, %c0_35], %36 {strides = array<i32>} : memref<1x4x128xf32, #tpu.memory_space<vmem>>, vector<1x4x128xf32>,
    return
  }
  func.func @transform_0(%arg0: i32) -> (i32, i32, i32) {
    %c0_i32 = arith.constant 0 : i32
    %c0_i32_0 = arith.constant 0 : i32
    %c0_i32_1 = arith.constant 0 : i32
    return %arg0, %c0_i32, %c0_i32_0 : i32, i32, i32
  }
  func.func @transform_1(%arg0: i32) -> (i32, i32, i32) {
    %c0_i32 = arith.constant 0 : i32
    %c0_i32_0 = arith.constant 0 : i32
    %c0_i32_1 = arith.constant 0 : i32
    %c0_i32_2 = arith.constant 0 : i32
    return %c0_i32, %c0_i32_0, %c0_i32_1 : i32, i32, i32
  }
  func.func @transform_2(%arg0: i32) -> (i32, i32, i32) {
    %c0_i32 = arith.constant 0 : i32
    %c0_i32_0 = arith.constant 0 : i32
    %c0_i32_1 = arith.constant 0 : i32
    %c0_i32_2 = arith.constant 0 : i32
    return %c0_i32, %c0_i32_0, %c0_i32_1 : i32, i32, i32
  }
  func.func @transform_3(%arg0: i32) -> (i32, i32) {
    %c0_i32 = arith.constant 0 : i32
    %c0_i32_0 = arith.constant 0 : i32
    %c0_i32_1 = arith.constant 0 : i32
    return %c0_i32, %c0_i32_0 : i32, i32
  }
  func.func @transform_4(%arg0: i32) -> (i32, i32, i32) {
    %c0_i32 = arith.constant 0 : i32
    %c0_i32_0 = arith.constant 0 : i32
    %c0_i32_1 = arith.constant 0 : i32
    return %arg0, %c0_i32, %c0_i32_0 : i32, i32, i32
  }
}

</mosaic_0001>

<bundles_post_ra>
// kernel: tpu_custom_call.1
= control target key start
LH: loop header
LB: loop body
LE: loop exit
PB: predicated region body
PF: predicated region fallthrough
CT: control target
= control target key end

     0   :  { %9 = vsyncpa [#allocation3], 0  ;;  %s964_s0 = inlined_call_operand.vmem [shape: f32[2,64,16], index: 0, kind: input, shape index: {}]   ;;  %s965_s1 = inlined_call_operand.vmem [shape: f32[4,4,16], index: 1, kind: input, shape index: {}]   ;;  %s966_s2 = inlined_call_operand.hbm [shape: f32[4,64,128], index: 2, kind: input, shape index: {}]   ;;  %s967_s3 = inlined_call_operand.vmem [shape: f32[1,128], index: 3, kind: input, shape index: {}]   ;;  %s968_s4 = inlined_call_operand.hbm [shape: f32[2,4,128], index: 4, kind: output, shape index: {}]  }
   0x1   :  { %10 = vsyncpa [#allocation4], 0 }
   0x2   :  { %12 = vsyncpa [#allocation4 + $0x1], 0  ;;  %s804_s15 = smov 0   ;;  %s806_s16 = smov 0  }
   0x3   :  { %s808_s17 = smov 0   ;;  %s810_s18 = smov 0  }
   0x4 LB: > { %s825_s19 = sadd.s32 4294967295, %s774_s18   ;;  %s568_s20 = sadd.s32 4294967294, %s774_s18   ;;  %s774_s18 = sphi %s810_s18, %s974_s18   ;;  %s770_s17 = sphi %s808_s17, %s973_s17   ;;  %s766_s16 = sphi %s806_s16, %s972_s16   ;;  %s762_s15 = sphi %s804_s15, %s971_s15  }
   0x5   : > { %s829_s21 = sadd.s32 1, %s774_s18   ;;  %s114_s22 = sadd.s32 1, %s770_s17 }
   0x6   : > { %s111_s23 = ssub.s32 %s774_s18, %s829_s21  ;;  %p124_p0 = scmp.ne.s32.totalorder %s770_s17, %s766_s16 }
   0x7   : > { %p112_p1 = scmp.eq.s32.totalorder %s111_s23, 0  ;;  %p125_p2 = scmp.eq.s32.totalorder %s825_s19, 1 }
   0x8   : > { %p130_p3 = scmp.ne.s32.totalorder %s766_s16, %s762_s15  ;;  %p131_p4 = scmp.eq.s32.totalorder %s568_s20, 1 }
   0x9   : > { %s840_s24 = scalar_select %p112_p1, %s770_s17, %s114_s22  }
   0xa   : > { %p842_p5 = por %p125_p2, %p124_p0  ;;  %p846_p6 = por %p131_p4, %p130_p3 }
   0xb   : > { %p569_p7 = scmp.ge.s32.totalorder %s774_s18, 1  ;;  %p138_p8 = scmp.lt.s32.totalorder %s774_s18, 3 }
   0xc   : > { %p639_p9 = scmp.eq.s32.totalorder %s825_s19, 0  ;;  %s152_s29 = sshll.u32 %s966_s2, 4  ;;  %s153_s29 = int_to_ptr.hbm [resolvable:$true] %s152_s29 }
   0xd   : > { %p139_p10 = pnand %p569_p7, %p138_p8  ;;  %s776_s30 = smov [#allocation2]  }
   0xe   : > { %s154_s5 = sshll.u32 %s776_s30, 4  ;;  %s777_s6 = smov 128   ;;  %s155_s5 = int_to_ptr.vmem [resolvable:$true] %s154_s5 }
   0xf   : > { %p631_p11 = pneg %p139_p10  ;;  %s778_s7 = smov 8  }
  0x10   : > { %181 = sbr.rel (%p139_p10) target bundleno = 467 (0x1d3), region = 36 }
  0x11   : > { %p632_p12 = pnand %p639_p9, %p631_p11 }
  0x13   : > { %634 = dma.hbm_to_vmem [thread:$0]  (!%p632_p12), %s153_s29, 4096, %s155_s5, [#allocation3], %s777_s6, %s777_s6, %s778_s7  }
  0x15   : > { %753 = dma.done.wait (%p639_p9), [#allocation3], 4096  }
  0x16   : > { %755 = vsyncadd (%p639_p9), [#allocation3], 4294963200  ;;  %p208_p13 = scmp.lt.s32.totalorder %s825_s19, 1  ;;  %vm222_vm0 = vcmask 130048   ;;  %v311_v2 = vld [vmem:[#allocation2 + $0x78] sm:$0xff]  ;;  %v310_v3 = vld [vmem:[#allocation2 + $0x70] sm:$0xff] }
  0x17   : > { %324 = vmatpush.msra.mxu2 %v311_v2  ;;  %v309_v4 = vld [vmem:[#allocation2 + $0x68] sm:$0xff]  ;;  %v277_v6 = vld [vmem:[#allocation2 + $0x38] sm:$0xff]  ;;  %v308_v7 = vld [vmem:[#allocation2 + $0x60] sm:$0xff]  ;;  %vm312_vm1 = vcmask 523264   ;;  %s205_s30 = sand.u32 1, %s766_s16   ;;  %s621_s6 = sshll.u32 %s825_s19, 2 }
  0x18   : > { %s209_s8 = scalar_select %p208_p13, %s825_s19, 1  ;;  %347 = vmatpush.msra.mxu3 %v277_v6  ;;  %v276_v8 = vld [vmem:[#allocation2 + $0x30] sm:$0xff]  ;;  %v307_v9 = vld [vmem:[#allocation2 + $0x58] sm:$0xff]  ;;  %v275_v10 = vld [vmem:[#allocation2 + $0x28] sm:$0xff] }
  0x19   : > { %325 = vmatpush.msra.mxu2 %v310_v3  ;;  %v306_v12 = vld [vmem:[#allocation2 + $0x50] sm:$0xff]  ;;  %v274_v13 = vld [vmem:[#allocation2 + $0x20] sm:$0xff]  ;;  %v305_v14 = vld [vmem:[#allocation2 + $0x48] sm:$0xff]  ;;  %s574_s5 = sshll.u32 %s205_s30, 2  ;;  %s482_s19 = scalar_lea.sflag [#allocation4], %s205_s30 }
  0x1a   : > { %s624_s9 = sshll.u32 %s209_s8, 6  ;;  %348 = vmatpush.msra.mxu3 %v276_v8  ;;  %v273_v15 = vld [vmem:[#allocation2 + $0x18] sm:$0xff]  ;;  %v304_v17 = vld [vmem:[#allocation2 + $0x40] sm:$0xff]  ;;  %v272_v18 = vld [vmem:[#allocation2 + $0x10] sm:$0xff]  ;;  %s728_s28 = scalar_lea.hbm %s968_s4, 8 }
  0x1b   : > { %s867_s12 = scalar_lea.vmem %s964_s0, %s624_s9  ;;  %326 = vmatpush.msra.mxu2 %v309_v4  ;;  %v271_v19 = vld [vmem:[#allocation2 + $0x8] sm:$0xff]  ;;  %v221_v23 = vld [vmem:[%s965_s1] sm:$0xf]  ;;  %v586_v24 = vld [vmem:[%s965_s1 + $0x4] sm:$0xf]  ;;  %s492_s9 = scalar_lea.hbm %s968_s4, %s621_s6 }
  0x1c   : > { %v220_v0 = vld [vmem:[%s867_s12 + $0x38] sm:$0xff]  ;;  %v219_v1 = vld [vmem:[%s867_s12 + $0x30] sm:$0xff]  ;;  %v218_v5 = vld [vmem:[%s867_s12 + $0x28] sm:$0xff]  ;;  %349 = vmatpush.msra.mxu3 %v275_v10  ;;  %s496_s14 = sshll.u32 %s492_s9, 4  ;;  %s497_s14 = int_to_ptr.hbm [resolvable:$true] %s496_s14 }
  0x1d   : > { %577 = vmatpush.xpose.msk.msra.mxu0 %vm222_vm0, %v220_v0  ;;  %587 = vmatpush.xpose.msk.msra.mxu1 %vm222_vm0, %v220_v0  ;;  %v217_v11 = vld [vmem:[%s867_s12 + $0x20] sm:$0xff]  ;;  %v216_v16 = vld [vmem:[%s867_s12 + $0x18] sm:$0xff]  ;;  %v215_v20 = vld [vmem:[%s867_s12 + $0x10] sm:$0xff]  ;;  %s722_s20 = sshra.s32 %s497_s14, 4  ;;  %s723_s20 = int_to_ptr.hbm [resolvable:$true] %s722_s20 }
  0x1e   : > { %327 = vmatpush.msra.mxu2 %v308_v7  ;;  %350 = vmatpush.msra.mxu3 %v274_v13  ;;  %v214_v21 = vld [vmem:[%s867_s12 + $0x8] sm:$0xff]  ;;  %v213_v22 = vld [vmem:[%s867_s12] sm:$0xff]  ;;  %v392_v27 = vld [vmem:[#allocation2 + $0xb8] sm:$0xff]  ;;  %s207_s12 = scalar_lea.vmem [#allocation5], %s574_s5  ;;  %s724_s22 = scalar_lea.hbm %s723_s20, 4 }
  0x1f   : > { %v270_v25 = vld [vmem:[#allocation2] sm:$0xff]  ;;  %v609_v26 = vld [vmem:[%s965_s1 + $0xc] sm:$0xf]  ;;  %v391_v28 = vld [vmem:[#allocation2 + $0xb0] sm:$0xff]  ;;  %s494_s13 = sshll.u32 %s207_s12, 4  ;;  %p725_p0 = scmp.ne.s32.totalorder %s723_s20, %s724_s22  ;;  %s495_s13 = int_to_ptr.vmem [resolvable:$true] %s494_s13 }
  0x20   : > { %328 = vmatpush.msra.mxu2 %v307_v9  ;;  %351 = vmatpush.msra.mxu3 %v273_v15  ;;  %v390_v29 = vld [vmem:[#allocation2 + $0xa8] sm:$0xff]  ;;  %v389_v33 = vld [vmem:[#allocation2 + $0xa0] sm:$0xff]  ;;  %v388_v34 = vld [vmem:[#allocation2 + $0x98] sm:$0xff]  ;;  %p729_p3 = scmp.lt.s32.totalorder %s723_s20, %s968_s4  ;;  %p730_p4 = scmp.lt.s32.totalorder %s728_s28, %s724_s22 }
  0x21   : > { %578 = vmatpush.xpose.msk.msra.mxu0 %vm222_vm0, %v219_v1  ;;  %588 = vmatpush.xpose.msk.msra.mxu1 %vm222_vm0, %v219_v1  ;;  %v598_v32 = vld [vmem:[%s965_s1 + $0x8] sm:$0xf]  ;;  %v450_v35 = vld [vmem:[#allocation2 + $0xf8] sm:$0xff]  ;;  %v387_v36 = vld [vmem:[#allocation2 + $0x90] sm:$0xff]  ;;  %p726_p1 = pnand %p725_p0, %p842_p5 }
  0x22   : > { %329 = vmatpush.msra.mxu2 %v306_v12  ;;  %352 = vmatpush.msra.mxu3 %v272_v18  ;;  %v449_v37 = vld [vmem:[#allocation2 + $0xf0] sm:$0xff]  ;;  %v386_v38 = vld [vmem:[#allocation2 + $0x88] sm:$0xff]  ;;  %v385_v40 = vld [vmem:[#allocation2 + $0x80] sm:$0xff]  ;;  %p731_p7 = por %p730_p4, %p729_p3 }
  0x23   : > { %v448_v39 = vld [vmem:[#allocation2 + $0xe8] sm:$0xff]  ;;  %v447_v41 = vld [vmem:[#allocation2 + $0xe0] sm:$0xff]  ;;  %v446_v42 = vld [vmem:[#allocation2 + $0xd8] sm:$0xff]  ;;  %p727_p2 = pneg %p726_p1 }
  0x24   : > { %330 = vmatpush.msra.mxu2 %v305_v14  ;;  %353 = vmatpush.msra.mxu3 %v271_v19  ;;  %v445_v43 = vld [vmem:[#allocation2 + $0xd0] sm:$0xff]  ;;  %v444_v44 = vld [vmem:[#allocation2 + $0xc8] sm:$0xff]  ;;  %v443_v45 = vld [vmem:[#allocation2 + $0xc0] sm:$0xff] }
  0x25   : > { %579 = vmatpush.xpose.msk.msra.mxu0 %vm222_vm0, %v218_v5  ;;  %589 = vmatpush.xpose.msk.msra.mxu1 %vm222_vm0, %v218_v5  ;;  %v677_v54 = vld [vmem:[%s967_s3] ss:$0 sm:$0xff]  ;;  %p732_p8 = pnand %p731_p7, %p727_p2 }
  0x26   : > { %331 = vmatpush.msra.mxu2 %v304_v17  ;;  %354 = vmatpush.msra.mxu3 %v270_v25 }
  0x28   : > { %599 = vmatpush.xpose.msk.msrb.mxu2 %vm222_vm0, %v220_v0  ;;  %404 = vmatpush.msrb.mxu3 %v392_v27 }
  0x29   : > { %580 = vmatpush.xpose.msk.msra.mxu0 %vm222_vm0, %v217_v11  ;;  %590 = vmatpush.xpose.msk.msra.mxu1 %vm222_vm0, %v217_v11 }
  0x2a   : > { %405 = vmatpush.msrb.mxu3 %v391_v28 }
  0x2c   : > { %600 = vmatpush.xpose.msk.msrb.mxu2 %vm222_vm0, %v219_v1  ;;  %406 = vmatpush.msrb.mxu3 %v390_v29 }
  0x2d   : > { %581 = vmatpush.xpose.msk.msra.mxu0 %vm222_vm0, %v216_v16  ;;  %591 = vmatpush.xpose.msk.msra.mxu1 %vm222_vm0, %v216_v16 }
  0x2e   : > { %407 = vmatpush.msrb.mxu3 %v389_v33 }
  0x30   : > { %601 = vmatpush.xpose.msk.msrb.mxu2 %vm222_vm0, %v218_v5  ;;  %408 = vmatpush.msrb.mxu3 %v388_v34 }
  0x31   : > { %582 = vmatpush.xpose.msk.msra.mxu0 %vm222_vm0, %v215_v20  ;;  %592 = vmatpush.xpose.msk.msra.mxu1 %vm222_vm0, %v215_v20 }
  0x32   : > { %409 = vmatpush.msrb.mxu3 %v387_v36 }
  0x34   : > { %602 = vmatpush.xpose.msk.msrb.mxu2 %vm222_vm0, %v217_v11  ;;  %410 = vmatpush.msrb.mxu3 %v386_v38 }
  0x35   : > { %583 = vmatpush.xpose.msk.msra.mxu0 %vm222_vm0, %v214_v21  ;;  %593 = vmatpush.xpose.msk.msra.mxu1 %vm222_vm0, %v214_v21 }
  0x36   : > { %411 = vmatpush.msrb.mxu3 %v385_v40 }
  0x38   : > { %603 = vmatpush.xpose.msk.msrb.mxu2 %vm222_vm0, %v216_v16 }
  0x39   : > { %584 = vmatpush.xpose.msk.msra.mxu0 %vm222_vm0, %v213_v22  ;;  %594 = vmatpush.xpose.msk.msra.mxu1 %vm222_vm0, %v213_v22 }
  0x3c   : > { %585 = vmatmul.msk.f32.vlgmr.msra.gmra.mxu0 %vm222_vm0, %v221_v23  ;;  %595 = vmatmul.msk.f32.vlgmr.msra.gmra.mxu1 %vm222_vm0, %v586_v24 }
  0x3d   : > { %610 = vmatpush.xpose.msk.msrb.mxu0 %vm222_vm0, %v220_v0  ;;  %604 = vmatpush.xpose.msk.msrb.mxu2 %vm222_vm0, %v215_v20 }
  0x3e   : > { %462 = vmatpush.msrb.mxu1 %v450_v35 }
  0x40   : > { %463 = vmatpush.msrb.mxu1 %v449_v37 }
  0x41   : > { %611 = vmatpush.xpose.msk.msrb.mxu0 %vm222_vm0, %v219_v1  ;;  %605 = vmatpush.xpose.msk.msrb.mxu2 %vm222_vm0, %v214_v21 }
  0x42   : > { %464 = vmatpush.msrb.mxu1 %v448_v39 }
  0x44   : > { %465 = vmatpush.msrb.mxu1 %v447_v41 }
  0x45   : > { %612 = vmatpush.xpose.msk.msrb.mxu0 %vm222_vm0, %v218_v5  ;;  %606 = vmatpush.xpose.msk.msrb.mxu2 %vm222_vm0, %v213_v22 }
  0x46   : > { %466 = vmatpush.msrb.mxu1 %v446_v42 }
  0x48   : > { %467 = vmatpush.msrb.mxu1 %v445_v43 }
  0x49   : > { %613 = vmatpush.xpose.msk.msrb.mxu0 %vm222_vm0, %v217_v11 }
  0x4a   : > { %468 = vmatpush.msrb.mxu1 %v444_v44 }
  0x4c   : > { %469 = vmatpush.msrb.mxu1 %v443_v45 }
  0x4d   : > { %614 = vmatpush.xpose.msk.msrb.mxu0 %vm222_vm0, %v216_v16 }
  0x51   : > { %615 = vmatpush.xpose.msk.msrb.mxu0 %vm222_vm0, %v215_v20 }
  0x55   : > { %616 = vmatpush.xpose.msk.msrb.mxu0 %vm222_vm0, %v214_v21 }
  0x59   : > { %617 = vmatpush.xpose.msk.msrb.mxu0 %vm222_vm0, %v213_v22 }
  0x5c   : > { %618 = vmatmul.msk.f32.vlgmr.msrb.gmra.mxu0 %vm222_vm0, %v609_v26 }
  0xb9   : > { %v267_v30 = vpop.f32.mrf.mxu0  ;;  %v300_v31 = vpop.f32.mrf.mxu1 }
  0xba   : > { %596 = vmatmul.msk.f32.vlgmr.msra.gmra.mxu2 %vm312_vm1, %v300_v31  ;;  %597 = vmatmul.msk.f32.vlgmr.msra.gmra.mxu3 %vm312_vm1, %v267_v30 }
  0xc2   : > { %607 = vmatmul.msk.f32.vlgmr.msrb.gmra.mxu2 %vm222_vm0, %v598_v32 }
  0xd9   : > { %v439_v46 = vpop.f32.mrf.mxu0 }
  0xda   : > { %619 = vmatmul.msk.f32.vlgmr.msrb.gmra.mxu1 %vm312_vm1, %v439_v46 }
 0x13d   : > { %v333_v47 = vpop.f32.mrf.mxu2  ;;  %v356_v49 = vpop.f32.mrf.mxu3 }
 0x13e   : > { %v357_v50 = vadd.f32 %v356_v49, %v333_v47 }
 0x145   : > { %v381_v48 = vpop.f32.mrf.mxu2 }
 0x146   : > { %608 = vmatmul.msk.f32.vlgmr.msrb.gmra.mxu3 %vm312_vm1, %v381_v48 }
 0x157   : > { %v471_v52 = vpop.f32.mrf.mxu1 }
 0x1c9   : > { %v413_v51 = vpop.f32.mrf.mxu3 }
 0x1ca   : > { %v416_v53 = vadd.f32 %v413_v51, %v357_v50 }
 0x1cc   : > { %v474_v55 = vadd.f32 %v471_v52, %v416_v53 }
 0x1ce   : > { %v479_v56 = vadd.f32 %v677_v54, %v474_v55 }
 0x1d0   : > { %480 = vst [vmem:[%s207_s12] sm:$0xf] %v479_v56 }
 0x1d1   : > { %735 = shalt.err (!%p732_p8)
}
 0x1d2   : > { %629 = dma.vmem_to_hbm [thread:$0]  (%p842_p5), %s495_s13, 64, %s497_s14, %s482_s19  }
 0x1d3 PF: > { %p641_p9 = scmp.ge.s32.totalorder %s774_s18, 2  ;;  %s508_s30 = sand.u32 1, %s762_s15  }
 0x1d4   : > { %s509_s6 = scalar_lea.sflag [#allocation4], %s508_s30 }
 0x1d5   : > { %p636_p10 = pnand %p641_p9, %p846_p6 }
 0x1d7   : > { %p637_p11 = pneg %p636_p10 }
 0x1d9   : > { %757 = dma.done.wait (%p637_p11), %s509_s6, 64  }
 0x1da   : > { %759 = vsyncadd (%p637_p11), %s509_s6, 4294967232  ;;  %p15_p12 = scmp.ge.s32.totalorder %s829_s21, 4   ;;  %s971_s15 = smov %s766_s16 }
 0x1db   : > { %s972_s16 = smov %s770_s17  ;;  %s973_s17 = smov %s840_s24 }
 0x1dc   : > { %s974_s18 = smov %s829_s21  ;;  %17 = sbr.rel (!%p15_p12) target bundleno = 4 (0x4), region = 82 }
 0x1e1   :  { %515 = vsyncpa [#allocation3], 1 }
 0x1e2   :  { %517 = vsyncpa [#allocation3 + $0x1], 1 }
 0x1e3   :  { %518 = vsyncpa [#allocation4], 1 }
 0x1e4   :  { %520 = vsyncpa [#allocation4 + $0x1], 1 }

</bundles_post_ra>
